<compile_context>
chip_gen: v7x
topology: tpu7x:2x2x1
jax: 0.10.0
libtpu: 0.0.40
codegen_flags: <defaults>
</compile_context>

<pallas_src>
import jax
import jax.numpy as jnp
from jax.experimental import pallas as pl
from jax.experimental.pallas import tpu as pltpu

# ----------------------------- model dims -----------------------------------
PARAMS = dict(
    indim=16,
    controldim=8,
    hidden_dim=32,
    obsdim=32,
    outdim=16,
    n_targets=4,   # used only by self.lr, which forward() never calls
)
BATCH = 8
N_LAYERS = 6       # layers per MLP (encoder / B / decoder)
LANES = 128        # lane width of the packed parameter slab
ROW_ALIGN = 16     # bf16 sublane tile -> keep every packed piece tile-aligned

SELU_ALPHA = 1.6732632423543772
SELU_SCALE = 1.0507009873554805


def _selu(x):
    # evaluated in f32; exp lands on the EUP slot, rest on the VPU
    return SELU_SCALE * jnp.where(x > 0, x, SELU_ALPHA * (jnp.exp(x) - 1.0))


# ----------------------------- param init (PyTorch-equivalent) ---------------
def _make_linear(key, fan_in, fan_out, bias=True):
    kw, kb = jax.random.split(key)
    bound = 1.0 / jnp.sqrt(fan_in)
    w = jax.random.uniform(kw, (fan_in, fan_out), jnp.float32, -bound, bound)
    if bias:
        b = jax.random.uniform(kb, (fan_out,), jnp.float32, -bound, bound)
        return w, b
    return w


def _make_mlp(key, in_dim, hidden, out_dim):
    dims = [in_dim] + [hidden] * (N_LAYERS - 1) + [out_dim]
    keys = jax.random.split(key, N_LAYERS)
    return [_make_linear(k, di, do) for k, di, do in zip(keys, dims[:-1], dims[1:])]


def init_params(key, p):
    k_enc, k_b, k_k, k_dec = jax.random.split(key, 4)
    # TODO(synk): self.lr (obsdim -> n_targets) is defined in __init__ but never
    # used in forward(), so it is intentionally not materialized here.
    return dict(
        enc=_make_mlp(k_enc, p["indim"], p["hidden_dim"], p["obsdim"]),
        B=_make_mlp(k_b, p["controldim"], p["hidden_dim"], p["obsdim"]),
        K=_make_linear(k_k, p["obsdim"], p["obsdim"], bias=False),
        dec=_make_mlp(k_dec, p["obsdim"], p["hidden_dim"], p["outdim"]),
    )


# ----------------------------- parameter packing -----------------------------
def _blockdiag(a, b):
    m = jnp.zeros((a.shape[0] + b.shape[0], a.shape[1] + b.shape[1]), jnp.float32)
    m = m.at[: a.shape[0], : a.shape[1]].set(a)
    m = m.at[a.shape[0]:, a.shape[1]:].set(b)
    return m


def pack_params(raw):
    """Fuse encoder/B block-diagonally, fold K into the fused last layer, and
    pack everything into one lane-padded bf16 slab [R, 128].

    Returns (slab, layout); layout is a tuple of static
    (w_row_off, w_rows, cols, b_row_off) per layer, in execution order
    (6 fused enc/B layers, then 6 decoder layers)."""
    enc, Bm, K, dec = raw["enc"], raw["B"], raw["K"], raw["dec"]

    layers = []
    for i in range(N_LAYERS):
        We, be = enc[i]
        Wb, bb = Bm[i]
        if i < N_LAYERS - 1:
            layers.append((_blockdiag(We, Wb), jnp.concatenate([be, bb])))
        else:
            # Fold K:  yk1 = (enc(x0) + B(u0)) @ K
            layers.append((jnp.concatenate([We @ K, Wb @ K], axis=0),
                           (be + bb) @ K))
    layers += list(dec)

    pieces, layout, off = [], [], 0

    def _append(arr_2d):
        nonlocal off
        r, c = arr_2d.shape
        r_pad = -r % ROW_ALIGN
        pieces.append(jnp.pad(arr_2d, ((0, r_pad), (0, LANES - c))))
        start = off
        off += r + r_pad
        return start

    for W, b in layers:
        w_off = _append(W)
        b_off = _append(b.reshape(1, -1))
        layout.append((w_off, W.shape[0], W.shape[1], b_off))

    slab = jnp.concatenate(pieces, axis=0).astype(jnp.bfloat16)
    return slab, tuple(layout)


# ----------------------------- kernel ----------------------------------------
def _make_kernel(layout):
    n_total = len(layout)

    def kernel(xu_ref, slab_ref, out_ref):
        x = xu_ref[...]                                   # bf16 [B, indim+controldim]
        y = x.astype(jnp.float32)
        for li, (w_off, w_rows, cols, b_off) in enumerate(layout):
            w = slab_ref[pl.ds(w_off, w_rows), pl.ds(0, cols)]              # bf16
            b = slab_ref[pl.ds(b_off, 1), pl.ds(0, cols)].astype(jnp.float32)
            y = jnp.dot(x, w, preferred_element_type=jnp.float32) + b      # f32 acc
            last_fused = li == N_LAYERS - 1      # K-folded yk1, no SELU
            last_total = li == n_total - 1       # decoder output, no SELU
            if not (last_fused or last_total):
                y = _selu(y)                     # SELU in f32
            if not last_total:
                x = y.astype(jnp.bfloat16)       # bf16 input for next MXU push
        out_ref[...] = y.astype(out_ref.dtype)

    return kernel


# ----------------------------- wrapper ----------------------------------------
def deep_koopman_control(x0, u0, slab, layout):
    batch = x0.shape[0]
    outdim = layout[-1][2]
    xu = jnp.concatenate([x0, u0], axis=-1).astype(jnp.bfloat16)
    # TODO(synk): if this forward is called per timestep in a rollout, wrap a
    # grid=(T,) over timesteps with a constant index_map for `slab` so the
    # parameter slab stays VMEM-resident across steps (and mark a batch axis
    # "parallel" for the two v7x TensorCores once the batch is large).
    return pl.pallas_call(
        _make_kernel(layout),
        out_shape=jax.ShapeDtypeStruct((batch, outdim), jnp.float32),
        in_specs=[pl.BlockSpec(memory_space=pltpu.MemorySpace.VMEM),
                  pl.BlockSpec(memory_space=pltpu.MemorySpace.VMEM)],
        out_specs=pl.BlockSpec(memory_space=pltpu.MemorySpace.VMEM),
    )(xu, slab)


# ----------------------------- pure-JAX reference ------------------------------
def _ref_mlp(x, layers):
    for i, (W, b) in enumerate(layers):
        x = x @ W + b
        if i < len(layers) - 1:
            x = _selu(x)
    return x


def reference_forward(x0, u0, raw):
    yk0 = _ref_mlp(x0, raw["enc"])
    bu0 = _ref_mlp(u0, raw["B"])
    yk1 = (yk0 + bu0) @ raw["K"]
    return _ref_mlp(yk1, raw["dec"])


# ----------------------------- main --------------------------------------------
if __name__ == "__main__":
    key = jax.random.PRNGKey(0)
    k_x, k_u, k_p = jax.random.split(key, 3)

    x0 = jax.random.normal(k_x, (BATCH, PARAMS["indim"]), jnp.float32)
    u0 = jax.random.normal(k_u, (BATCH, PARAMS["controldim"]), jnp.float32)

    raw = init_params(k_p, PARAMS)
    slab, layout = pack_params(raw)

    x1 = deep_koopman_control(x0, u0, slab, layout)
    x1 = jax.block_until_ready(x1)

    x1_ref = reference_forward(x0, u0, raw)
    assert x1.shape == (BATCH, PARAMS["outdim"])
    # bf16 weights/activations on the MXU path -> looser tolerance than f32.
    assert jnp.allclose(x1, x1_ref, atol=5e-2, rtol=5e-2), "mismatch vs JAX reference"

    print("KERNEL_OK")
</pallas_src>

<mosaic_0001>
module attributes {stable_mosaic.version = 11 : i64} {
  func.func @kernel(%arg0: memref<8x24xbf16, #tpu.memory_space<vmem>>, %arg1: memref<736x128xbf16, #tpu.memory_space<vmem>>, %arg2: memref<8x16xf32, #tpu.memory_space<vmem>>) attributes {dimension_semantics = [], scalar_prefetch = 0 : i64, scratch_operands = 0 : i64, tpu.core_type = #tpu.core_type<tc>} {
    %c0 = arith.constant 0 : index
    %c0_0 = arith.constant 0 : index
    %0 = vector.load %arg0[%c0, %c0_0] : memref<8x24xbf16, #tpu.memory_space<vmem>>, vector<8x24xbf16>
    %c0_1 = arith.constant 0 : index
    %c0_2 = arith.constant 0 : index
    %1 = vector.load %arg1[%c0_1, %c0_2] : memref<736x128xbf16, #tpu.memory_space<vmem>>, vector<24x64xbf16>
    %c32 = arith.constant 32 : index
    %c0_3 = arith.constant 0 : index
    %2 = vector.load %arg1[%c32, %c0_3] : memref<736x128xbf16, #tpu.memory_space<vmem>>, vector<1x64xbf16>
    %3 = arith.extf %2 : vector<1x64xbf16> to vector<1x64xf32>
    %cst = arith.constant dense<0.000000e+00> : vector<8x64xf32>
    %4 = tpu.matmul %0, %1, %cst {dimension_numbers = #tpu.dot_dimension_numbers<[1], [0], [0], [1], [0, 0, 1, 1], [], []>} : vector<8x24xbf16>, vector<24x64xbf16>, vector<8x64xf32> -> vector<8x64xf32>
    %5 = vector.broadcast %3 : vector<1x64xf32> to vector<8x64xf32>
    %6 = arith.addf %4, %5 : vector<8x64xf32>
    %cst_4 = arith.constant 0.000000e+00 : f32
    %7 = vector.broadcast %cst_4 : f32 to vector<8x64xf32>
    %8 = arith.cmpf ogt, %6, %7 : vector<8x64xf32>
    %9 = math.exp %6 : vector<8x64xf32>
    %cst_5 = arith.constant 1.000000e+00 : f32
    %10 = vector.broadcast %cst_5 : f32 to vector<8x64xf32>
    %11 = arith.subf %9, %10 : vector<8x64xf32>
    %cst_6 = arith.constant 1.67326319 : f32
    %12 = vector.broadcast %cst_6 : f32 to vector<8x64xf32>
    %13 = arith.mulf %12, %11 : vector<8x64xf32>
    %14 = arith.select %8, %6, %13 : vector<8x64xi1>, vector<8x64xf32>
    %cst_7 = arith.constant 1.05070102 : f32
    %15 = vector.broadcast %cst_7 : f32 to vector<8x64xf32>
    %16 = arith.mulf %15, %14 : vector<8x64xf32>
    %17 = arith.truncf %16 : vector<8x64xf32> to vector<8x64xbf16>
    %c48 = arith.constant 48 : index
    %c0_8 = arith.constant 0 : index
    %18 = vector.load %arg1[%c48, %c0_8] : memref<736x128xbf16, #tpu.memory_space<vmem>>, vector<64x64xbf16>
    %c112 = arith.constant 112 : index
    %c0_9 = arith.constant 0 : index
    %19 = vector.load %arg1[%c112, %c0_9] : memref<736x128xbf16, #tpu.memory_space<vmem>>, vector<1x64xbf16>
    %20 = arith.extf %19 : vector<1x64xbf16> to vector<1x64xf32>
    %cst_10 = arith.constant dense<0.000000e+00> : vector<8x64xf32>
    %21 = tpu.matmul %17, %18, %cst_10 {dimension_numbers = #tpu.dot_dimension_numbers<[1], [0], [0], [1], [0, 0, 1, 1], [], []>} : vector<8x64xbf16>, vector<64x64xbf16>, vector<8x64xf32> -> vector<8x64xf32>
    %22 = vector.broadcast %20 : vector<1x64xf32> to vector<8x64xf32>
    %23 = arith.addf %21, %22 : vector<8x64xf32>
    %cst_11 = arith.constant 0.000000e+00 : f32
    %24 = vector.broadcast %cst_11 : f32 to vector<8x64xf32>
    %25 = arith.cmpf ogt, %23, %24 : vector<8x64xf32>
    %26 = math.exp %23 : vector<8x64xf32>
    %cst_12 = arith.constant 1.000000e+00 : f32
    %27 = vector.broadcast %cst_12 : f32 to vector<8x64xf32>
    %28 = arith.subf %26, %27 : vector<8x64xf32>
    %cst_13 = arith.constant 1.67326319 : f32
    %29 = vector.broadcast %cst_13 : f32 to vector<8x64xf32>
    %30 = arith.mulf %29, %28 : vector<8x64xf32>
    %31 = arith.select %25, %23, %30 : vector<8x64xi1>, vector<8x64xf32>
    %cst_14 = arith.constant 1.05070102 : f32
    %32 = vector.broadcast %cst_14 : f32 to vector<8x64xf32>
    %33 = arith.mulf %32, %31 : vector<8x64xf32>
    %34 = arith.truncf %33 : vector<8x64xf32> to vector<8x64xbf16>
    %c128 = arith.constant 128 : index
    %c0_15 = arith.constant 0 : index
    %35 = vector.load %arg1[%c128, %c0_15] : memref<736x128xbf16, #tpu.memory_space<vmem>>, vector<64x64xbf16>
    %c192 = arith.constant 192 : index
    %c0_16 = arith.constant 0 : index
    %36 = vector.load %arg1[%c192, %c0_16] : memref<736x128xbf16, #tpu.memory_space<vmem>>, vector<1x64xbf16>
    %37 = arith.extf %36 : vector<1x64xbf16> to vector<1x64xf32>
    %cst_17 = arith.constant dense<0.000000e+00> : vector<8x64xf32>
    %38 = tpu.matmul %34, %35, %cst_17 {dimension_numbers = #tpu.dot_dimension_numbers<[1], [0], [0], [1], [0, 0, 1, 1], [], []>} : vector<8x64xbf16>, vector<64x64xbf16>, vector<8x64xf32> -> vector<8x64xf32>
    %39 = vector.broadcast %37 : vector<1x64xf32> to vector<8x64xf32>
    %40 = arith.addf %38, %39 : vector<8x64xf32>
    %cst_18 = arith.constant 0.000000e+00 : f32
    %41 = vector.broadcast %cst_18 : f32 to vector<8x64xf32>
    %42 = arith.cmpf ogt, %40, %41 : vector<8x64xf32>
    %43 = math.exp %40 : vector<8x64xf32>
    %cst_19 = arith.constant 1.000000e+00 : f32
    %44 = vector.broadcast %cst_19 : f32 to vector<8x64xf32>
    %45 = arith.subf %43, %44 : vector<8x64xf32>
    %cst_20 = arith.constant 1.67326319 : f32
    %46 = vector.broadcast %cst_20 : f32 to vector<8x64xf32>
    %47 = arith.mulf %46, %45 : vector<8x64xf32>
    %48 = arith.select %42, %40, %47 : vector<8x64xi1>, vector<8x64xf32>
    %cst_21 = arith.constant 1.05070102 : f32
    %49 = vector.broadcast %cst_21 : f32 to vector<8x64xf32>
    %50 = arith.mulf %49, %48 : vector<8x64xf32>
    %51 = arith.truncf %50 : vector<8x64xf32> to vector<8x64xbf16>
    %c208 = arith.constant 208 : index
    %c0_22 = arith.constant 0 : index
    %52 = vector.load %arg1[%c208, %c0_22] : memref<736x128xbf16, #tpu.memory_space<vmem>>, vector<64x64xbf16>
    %c272 = arith.constant 272 : index
    %c0_23 = arith.constant 0 : index
    %53 = vector.load %arg1[%c272, %c0_23] : memref<736x128xbf16, #tpu.memory_space<vmem>>, vector<1x64xbf16>
    %54 = arith.extf %53 : vector<1x64xbf16> to vector<1x64xf32>
    %cst_24 = arith.constant dense<0.000000e+00> : vector<8x64xf32>
    %55 = tpu.matmul %51, %52, %cst_24 {dimension_numbers = #tpu.dot_dimension_numbers<[1], [0], [0], [1], [0, 0, 1, 1], [], []>} : vector<8x64xbf16>, vector<64x64xbf16>, vector<8x64xf32> -> vector<8x64xf32>
    %56 = vector.broadcast %54 : vector<1x64xf32> to vector<8x64xf32>
    %57 = arith.addf %55, %56 : vector<8x64xf32>
    %cst_25 = arith.constant 0.000000e+00 : f32
    %58 = vector.broadcast %cst_25 : f32 to vector<8x64xf32>
    %59 = arith.cmpf ogt, %57, %58 : vector<8x64xf32>
    %60 = math.exp %57 : vector<8x64xf32>
    %cst_26 = arith.constant 1.000000e+00 : f32
    %61 = vector.broadcast %cst_26 : f32 to vector<8x64xf32>
    %62 = arith.subf %60, %61 : vector<8x64xf32>
    %cst_27 = arith.constant 1.67326319 : f32
    %63 = vector.broadcast %cst_27 : f32 to vector<8x64xf32>
    %64 = arith.mulf %63, %62 : vector<8x64xf32>
    %65 = arith.select %59, %57, %64 : vector<8x64xi1>, vector<8x64xf32>
    %cst_28 = arith.constant 1.05070102 : f32
    %66 = vector.broadcast %cst_28 : f32 to vector<8x64xf32>
    %67 = arith.mulf %66, %65 : vector<8x64xf32>
    %68 = arith.truncf %67 : vector<8x64xf32> to vector<8x64xbf16>
    %c288 = arith.constant 288 : index
    %c0_29 = arith.constant 0 : index
    %69 = vector.load %arg1[%c288, %c0_29] : memref<736x128xbf16, #tpu.memory_space<vmem>>, vector<64x64xbf16>
    %c352 = arith.constant 352 : index
    %c0_30 = arith.constant 0 : index
    %70 = vector.load %arg1[%c352, %c0_30] : memref<736x128xbf16, #tpu.memory_space<vmem>>, vector<1x64xbf16>
    %71 = arith.extf %70 : vector<1x64xbf16> to vector<1x64xf32>
    %cst_31 = arith.constant dense<0.000000e+00> : vector<8x64xf32>
    %72 = tpu.matmul %68, %69, %cst_31 {dimension_numbers = #tpu.dot_dimension_numbers<[1], [0], [0], [1], [0, 0, 1, 1], [], []>} : vector<8x64xbf16>, vector<64x64xbf16>, vector<8x64xf32> -> vector<8x64xf32>
    %73 = vector.broadcast %71 : vector<1x64xf32> to vector<8x64xf32>
    %74 = arith.addf %72, %73 : vector<8x64xf32>
    %cst_32 = arith.constant 0.000000e+00 : f32
    %75 = vector.broadcast %cst_32 : f32 to vector<8x64xf32>
    %76 = arith.cmpf ogt, %74, %75 : vector<8x64xf32>
    %77 = math.exp %74 : vector<8x64xf32>
    %cst_33 = arith.constant 1.000000e+00 : f32
    %78 = vector.broadcast %cst_33 : f32 to vector<8x64xf32>
    %79 = arith.subf %77, %78 : vector<8x64xf32>
    %cst_34 = arith.constant 1.67326319 : f32
    %80 = vector.broadcast %cst_34 : f32 to vector<8x64xf32>
    %81 = arith.mulf %80, %79 : vector<8x64xf32>
    %82 = arith.select %76, %74, %81 : vector<8x64xi1>, vector<8x64xf32>
    %cst_35 = arith.constant 1.05070102 : f32
    %83 = vector.broadcast %cst_35 : f32 to vector<8x64xf32>
    %84 = arith.mulf %83, %82 : vector<8x64xf32>
    %85 = arith.truncf %84 : vector<8x64xf32> to vector<8x64xbf16>
    %c368 = arith.constant 368 : index
    %c0_36 = arith.constant 0 : index
    %86 = vector.load %arg1[%c368, %c0_36] : memref<736x128xbf16, #tpu.memory_space<vmem>>, vector<64x32xbf16>
    %c432 = arith.constant 432 : index
    %c0_37 = arith.constant 0 : index
    %87 = vector.load %arg1[%c432, %c0_37] : memref<736x128xbf16, #tpu.memory_space<vmem>>, vector<1x32xbf16>
    %88 = arith.extf %87 : vector<1x32xbf16> to vector<1x32xf32>
    %cst_38 = arith.constant dense<0.000000e+00> : vector<8x32xf32>
    %89 = tpu.matmul %85, %86, %cst_38 {dimension_numbers = #tpu.dot_dimension_numbers<[1], [0], [0], [1], [0, 0, 1, 1], [], []>} : vector<8x64xbf16>, vector<64x32xbf16>, vector<8x32xf32> -> vector<8x32xf32>
    %90 = vector.broadcast %88 : vector<1x32xf32> to vector<8x32xf32>
    %91 = arith.addf %89, %90 : vector<8x32xf32>
    %92 = arith.truncf %91 : vector<8x32xf32> to vector<8x32xbf16>
    %c448 = arith.constant 448 : index
    %c0_39 = arith.constant 0 : index
    %93 = vector.load %arg1[%c448, %c0_39] : memref<736x128xbf16, #tpu.memory_space<vmem>>, vector<32x32xbf16>
    %c480 = arith.constant 480 : index
    %c0_40 = arith.constant 0 : index
    %94 = vector.load %arg1[%c480, %c0_40] : memref<736x128xbf16, #tpu.memory_space<vmem>>, vector<1x32xbf16>
    %95 = arith.extf %94 : vector<1x32xbf16> to vector<1x32xf32>
    %cst_41 = arith.constant dense<0.000000e+00> : vector<8x32xf32>
    %96 = tpu.matmul %92, %93, %cst_41 {dimension_numbers = #tpu.dot_dimension_numbers<[1], [0], [0], [1], [0, 0, 1, 1], [], []>} : vector<8x32xbf16>, vector<32x32xbf16>, vector<8x32xf32> -> vector<8x32xf32>
    %97 = vector.broadcast %95 : vector<1x32xf32> to vector<8x32xf32>
    %98 = arith.addf %96, %97 : vector<8x32xf32>
    %cst_42 = arith.constant 0.000000e+00 : f32
    %99 = vector.broadcast %cst_42 : f32 to vector<8x32xf32>
    %100 = arith.cmpf ogt, %98, %99 : vector<8x32xf32>
    %101 = math.exp %98 : vector<8x32xf32>
    %cst_43 = arith.constant 1.000000e+00 : f32
    %102 = vector.broadcast %cst_43 : f32 to vector<8x32xf32>
    %103 = arith.subf %101, %102 : vector<8x32xf32>
    %cst_44 = arith.constant 1.67326319 : f32
    %104 = vector.broadcast %cst_44 : f32 to vector<8x32xf32>
    %105 = arith.mulf %104, %103 : vector<8x32xf32>
    %106 = arith.select %100, %98, %105 : vector<8x32xi1>, vector<8x32xf32>
    %cst_45 = arith.constant 1.05070102 : f32
    %107 = vector.broadcast %cst_45 : f32 to vector<8x32xf32>
    %108 = arith.mulf %107, %106 : vector<8x32xf32>
    %109 = arith.truncf %108 : vector<8x32xf32> to vector<8x32xbf16>
    %c496 = arith.constant 496 : index
    %c0_46 = arith.constant 0 : index
    %110 = vector.load %arg1[%c496, %c0_46] : memref<736x128xbf16, #tpu.memory_space<vmem>>, vector<32x32xbf16>
    %c528 = arith.constant 528 : index
    %c0_47 = arith.constant 0 : index
    %111 = vector.load %arg1[%c528, %c0_47] : memref<736x128xbf16, #tpu.memory_space<vmem>>, vector<1x32xbf16>
    %112 = arith.extf %111 : vector<1x32xbf16> to vector<1x32xf32>
    %cst_48 = arith.constant dense<0.000000e+00> : vector<8x32xf32>
    %113 = tpu.matmul %109, %110, %cst_48 {dimension_numbers = #tpu.dot_dimension_numbers<[1], [0], [0], [1], [0, 0, 1, 1], [], []>} : vector<8x32xbf16>, vector<32x32xbf16>, vector<8x32xf32> -> vector<8x32xf32>
    %114 = vector.broadcast %112 : vector<1x32xf32> to vector<8x32xf32>
    %115 = arith.addf %113, %114 : vector<8x32xf32>
    %cst_49 = arith.constant 0.000000e+00 : f32
    %116 = vector.broadcast %cst_49 : f32 to vector<8x32xf32>
    %117 = arith.cmpf ogt, %115, %116 : vector<8x32xf32>
    %118 = math.exp %115 : vector<8x32xf32>
    %cst_50 = arith.constant 1.000000e+00 : f32
    %119 = vector.broadcast %cst_50 : f32 to vector<8x32xf32>
    %120 = arith.subf %118, %119 : vector<8x32xf32>
    %cst_51 = arith.constant 1.67326319 : f32
    %121 = vector.broadcast %cst_51 : f32 to vector<8x32xf32>
    %122 = arith.mulf %121, %120 : vector<8x32xf32>
    %123 = arith.select %117, %115, %122 : vector<8x32xi1>, vector<8x32xf32>
    %cst_52 = arith.constant 1.05070102 : f32
    %124 = vector.broadcast %cst_52 : f32 to vector<8x32xf32>
    %125 = arith.mulf %124, %123 : vector<8x32xf32>
    %126 = arith.truncf %125 : vector<8x32xf32> to vector<8x32xbf16>
    %c544 = arith.constant 544 : index
    %c0_53 = arith.constant 0 : index
    %127 = vector.load %arg1[%c544, %c0_53] : memref<736x128xbf16, #tpu.memory_space<vmem>>, vector<32x32xbf16>
    %c576 = arith.constant 576 : index
    %c0_54 = arith.constant 0 : index
    %128 = vector.load %arg1[%c576, %c0_54] : memref<736x128xbf16, #tpu.memory_space<vmem>>, vector<1x32xbf16>
    %129 = arith.extf %128 : vector<1x32xbf16> to vector<1x32xf32>
    %cst_55 = arith.constant dense<0.000000e+00> : vector<8x32xf32>
    %130 = tpu.matmul %126, %127, %cst_55 {dimension_numbers = #tpu.dot_dimension_numbers<[1], [0], [0], [1], [0, 0, 1, 1], [], []>} : vector<8x32xbf16>, vector<32x32xbf16>, vector<8x32xf32> -> vector<8x32xf32>
    %131 = vector.broadcast %129 : vector<1x32xf32> to vector<8x32xf32>
    %132 = arith.addf %130, %131 : vector<8x32xf32>
    %cst_56 = arith.constant 0.000000e+00 : f32
    %133 = vector.broadcast %cst_56 : f32 to vector<8x32xf32>
    %134 = arith.cmpf ogt, %132, %133 : vector<8x32xf32>
    %135 = math.exp %132 : vector<8x32xf32>
    %cst_57 = arith.constant 1.000000e+00 : f32
    %136 = vector.broadcast %cst_57 : f32 to vector<8x32xf32>
    %137 = arith.subf %135, %136 : vector<8x32xf32>
    %cst_58 = arith.constant 1.67326319 : f32
    %138 = vector.broadcast %cst_58 : f32 to vector<8x32xf32>
    %139 = arith.mulf %138, %137 : vector<8x32xf32>
    %140 = arith.select %134, %132, %139 : vector<8x32xi1>, vector<8x32xf32>
    %cst_59 = arith.constant 1.05070102 : f32
    %141 = vector.broadcast %cst_59 : f32 to vector<8x32xf32>
    %142 = arith.mulf %141, %140 : vector<8x32xf32>
    %143 = arith.truncf %142 : vector<8x32xf32> to vector<8x32xbf16>
    %c592 = arith.constant 592 : index
    %c0_60 = arith.constant 0 : index
    %144 = vector.load %arg1[%c592, %c0_60] : memref<736x128xbf16, #tpu.memory_space<vmem>>, vector<32x32xbf16>
    %c624 = arith.constant 624 : index
    %c0_61 = arith.constant 0 : index
    %145 = vector.load %arg1[%c624, %c0_61] : memref<736x128xbf16, #tpu.memory_space<vmem>>, vector<1x32xbf16>
    %146 = arith.extf %145 : vector<1x32xbf16> to vector<1x32xf32>
    %cst_62 = arith.constant dense<0.000000e+00> : vector<8x32xf32>
    %147 = tpu.matmul %143, %144, %cst_62 {dimension_numbers = #tpu.dot_dimension_numbers<[1], [0], [0], [1], [0, 0, 1, 1], [], []>} : vector<8x32xbf16>, vector<32x32xbf16>, vector<8x32xf32> -> vector<8x32xf32>
    %148 = vector.broadcast %146 : vector<1x32xf32> to vector<8x32xf32>
    %149 = arith.addf %147, %148 : vector<8x32xf32>
    %cst_63 = arith.constant 0.000000e+00 : f32
    %150 = vector.broadcast %cst_63 : f32 to vector<8x32xf32>
    %151 = arith.cmpf ogt, %149, %150 : vector<8x32xf32>
    %152 = math.exp %149 : vector<8x32xf32>
    %cst_64 = arith.constant 1.000000e+00 : f32
    %153 = vector.broadcast %cst_64 : f32 to vector<8x32xf32>
    %154 = arith.subf %152, %153 : vector<8x32xf32>
    %cst_65 = arith.constant 1.67326319 : f32
    %155 = vector.broadcast %cst_65 : f32 to vector<8x32xf32>
    %156 = arith.mulf %155, %154 : vector<8x32xf32>
    %157 = arith.select %151, %149, %156 : vector<8x32xi1>, vector<8x32xf32>
    %cst_66 = arith.constant 1.05070102 : f32
    %158 = vector.broadcast %cst_66 : f32 to vector<8x32xf32>
    %159 = arith.mulf %158, %157 : vector<8x32xf32>
    %160 = arith.truncf %159 : vector<8x32xf32> to vector<8x32xbf16>
    %c640 = arith.constant 640 : index
    %c0_67 = arith.constant 0 : index
    %161 = vector.load %arg1[%c640, %c0_67] : memref<736x128xbf16, #tpu.memory_space<vmem>>, vector<32x32xbf16>
    %c672 = arith.constant 672 : index
    %c0_68 = arith.constant 0 : index
    %162 = vector.load %arg1[%c672, %c0_68] : memref<736x128xbf16, #tpu.memory_space<vmem>>, vector<1x32xbf16>
    %163 = arith.extf %162 : vector<1x32xbf16> to vector<1x32xf32>
    %cst_69 = arith.constant dense<0.000000e+00> : vector<8x32xf32>
    %164 = tpu.matmul %160, %161, %cst_69 {dimension_numbers = #tpu.dot_dimension_numbers<[1], [0], [0], [1], [0, 0, 1, 1], [], []>} : vector<8x32xbf16>, vector<32x32xbf16>, vector<8x32xf32> -> vector<8x32xf32>
    %165 = vector.broadcast %163 : vector<1x32xf32> to vector<8x32xf32>
    %166 = arith.addf %164, %165 : vector<8x32xf32>
    %cst_70 = arith.constant 0.000000e+00 : f32
    %167 = vector.broadcast %cst_70 : f32 to vector<8x32xf32>
    %168 = arith.cmpf ogt, %166, %167 : vector<8x32xf32>
    %169 = math.exp %166 : vector<8x32xf32>
    %cst_71 = arith.constant 1.000000e+00 : f32
    %170 = vector.broadcast %cst_71 : f32 to vector<8x32xf32>
    %171 = arith.subf %169, %170 : vector<8x32xf32>
    %cst_72 = arith.constant 1.67326319 : f32
    %172 = vector.broadcast %cst_72 : f32 to vector<8x32xf32>
    %173 = arith.mulf %172, %171 : vector<8x32xf32>
    %174 = arith.select %168, %166, %173 : vector<8x32xi1>, vector<8x32xf32>
    %cst_73 = arith.constant 1.05070102 : f32
    %175 = vector.broadcast %cst_73 : f32 to vector<8x32xf32>
    %176 = arith.mulf %175, %174 : vector<8x32xf32>
    %177 = arith.truncf %176 : vector<8x32xf32> to vector<8x32xbf16>
    %c688 = arith.constant 688 : index
    %c0_74 = arith.constant 0 : index
    %178 = vector.load %arg1[%c688, %c0_74] : memref<736x128xbf16, #tpu.memory_space<vmem>>, vector<32x16xbf16>
    %c720 = arith.constant 720 : index
    %c0_75 = arith.constant 0 : index
    %179 = vector.load %arg1[%c720, %c0_75] : memref<736x128xbf16, #tpu.memory_space<vmem>>, vector<1x16xbf16>
    %180 = arith.extf %179 : vector<1x16xbf16> to vector<1x16xf32>
    %cst_76 = arith.constant dense<0.000000e+00> : vector<8x16xf32>
    %181 = tpu.matmul %177, %178, %cst_76 {dimension_numbers = #tpu.dot_dimension_numbers<[1], [0], [0], [1], [0, 0, 1, 1], [], []>} : vector<8x32xbf16>, vector<32x16xbf16>, vector<8x16xf32> -> vector<8x16xf32>
    %182 = vector.broadcast %180 : vector<1x16xf32> to vector<8x16xf32>
    %183 = arith.addf %181, %182 : vector<8x16xf32>
    %c0_77 = arith.constant 0 : index
    %c0_78 = arith.constant 0 : index
    %184 = vector.load %arg2[%c0_77, %c0_78] : memref<8x16xf32, #tpu.memory_space<vmem>>, vector<8x16xf32>
    tpu.vector_store %arg2[%c0_77, %c0_78], %183 {strides = array<i32>} : memref<8x16xf32, #tpu.memory_space<vmem>>, vector<8x16xf32>,
    return
  }
}

</mosaic_0001>

<bundles_post_ra>
// kernel: tpu_custom_call.1
= control target key start
LH: loop header
LB: loop body
LE: loop exit
PB: predicated region body
PF: predicated region fallthrough
CT: control target
= control target key end

     0   :  { %7 = vsyncpa [#allocation3], 0  ;;  %s1501_s0 = inlined_call_operand.hbm [shape: bf16[8,24], index: 0, kind: input, shape index: {}]   ;;  %s1502_s1 = inlined_call_operand.hbm [shape: bf16[736,128], index: 1, kind: input, shape index: {}]   ;;  %s1503_s2 = inlined_call_operand.hbm [shape: f32[8,16], index: 2, kind: output, shape index: {}]  }
   0x1   :  { %8 = vsyncpa [#allocation6], 0 }
   0x2   :  { %9 = vsyncpa [#allocation4], 0  ;;  %s1353_s9 = smov [#allocation2]   ;;  %s1354_s11 = smov [#allocation5]  }
   0x3   :  { %s16_s10 = sshll.u32 %s1353_s9, 4  ;;  %s25_s12 = sshll.u32 %s1354_s11, 4  ;;  %s17_s10 = int_to_ptr.vmem [resolvable:$true] %s16_s10  ;;  %s1375_s12 = int_to_ptr.vmem [resolvable:$true] %s25_s12 }
   0x4   :  { %s1281_s15 = scalar_lea.hbm %s1501_s0, 64 }
   0x5   :  { %p1282_p0 = scmp.ne.s32.totalorder %s1501_s0, %s1281_s15  ;;  %p1285_p1 = scmp.lt.u32.totalorder %s1281_s15, %s1501_s0 }
   0x7   :  { %p1287_p2 = pnand %p1285_p1, %p1282_p0 }
   0x9   :  { %1290 = shalt.err (!%p1287_p2)
}
   0xa   :  { %s1291_s20 = scalar_lea.vmem %s17_s10, 64  ;;  %p1296_p4 = scmp.lt.s32.totalorder %s17_s10, %s17_s10 }
   0xb   :  { %p1292_p3 = scmp.ne.s32.totalorder %s17_s10, %s1291_s20  ;;  %p1297_p5 = scmp.lt.s32.totalorder %s1291_s20, %s1291_s20 }
   0xd   :  { %p1298_p6 = por %p1297_p5, %p1296_p4 }
   0xf   :  { %p1299_p7 = pnand %p1298_p6, %p1292_p3 }
  0x11   :  { %1302 = shalt.err (!%p1299_p7)
}
  0x12   :  { %19 = dma.hbm_to_vmem [thread:$0]  %s1501_s0, 64, %s17_s10, [#allocation3]  }
  0x13   :  { %s1303_s25 = scalar_lea.hbm %s1502_s1, 5888 }
  0x14   :  { %p1304_p8 = scmp.ne.s32.totalorder %s1502_s1, %s1303_s25  ;;  %p1307_p9 = scmp.lt.u32.totalorder %s1303_s25, %s1502_s1 }
  0x16   :  { %p1309_p10 = pnand %p1307_p9, %p1304_p8 }
  0x18   :  { %1312 = shalt.err (!%p1309_p10)
}
  0x19   :  { %s1313_s30 = scalar_lea.vmem %s1375_s12, 5888  ;;  %p1318_p12 = scmp.lt.s32.totalorder %s1375_s12, %s1375_s12 }
  0x1a   :  { %p1314_p11 = scmp.ne.s32.totalorder %s1375_s12, %s1313_s30  ;;  %p1319_p13 = scmp.lt.s32.totalorder %s1313_s30, %s1313_s30 }
  0x1c   :  { %p1320_p0 = por %p1319_p13, %p1318_p12 }
  0x1e   :  { %p1321_p1 = pnand %p1320_p0, %p1314_p11 }
  0x20   :  { %1324 = shalt.err (!%p1321_p1)
}
  0x21   :  { %s1355_s0 = smov 64   ;;  %s1356_s3 = smov 4  }
  0x22   :  { %31 = dma.hbm_to_vmem [thread:$0]  %s1502_s1, 5888, %s1375_s12, [#allocation6], %s1355_s0, %s1355_s0, %s1356_s3  }
  0x23   :  { %1347 = dma.done.wait [#allocation3], 64  }
  0x24   :  { %1348 = vsyncadd [#allocation3], 4294967232 }
  0x25   :  { %1349 = dma.done.wait [#allocation6], 5888  }
  0x26   :  { %1350 = vsyncadd [#allocation6], 4294961408  ;;  %v1357_v0 = vmov 0.0   ;;  %vm1358_vm0 = vmmov 0   ;;  %v1227_v1 = vld [vmem:[#allocation5] sm:$0xff]   ;;  %vm62_vm1 = vcmask 1043456   ;;  %v45_v9 = vlaneseq }
  0x27   :  { %1104 = vmatprep.subr.bf16.mxu0 %v1357_v0  ;;  %1108 = vmatprep.mubr.msk.bf16.mxu0 %vm1358_vm0, %v1357_v0  ;;  %v1228_v2 = vld [vmem:[#allocation5 + $0x8] ss:$0 sps:$4 sm:$0xff]   ;;  %vm58_vm2 = vcmask 195584   ;;  %v39_v4 = vld [vmem:[#allocation2] sm:$0xf]  ;;  %v1230_v6 = vld [vmem:[#allocation5 + $0x20] sm:$0xff]  }
  0x28   :  { %1112 = vmatprep.subr.bf16.mxu1 %v1357_v0  ;;  %1120 = vmatprep.mubr.msk.bf16.mxu1 %vm1358_vm0, %v1357_v0  ;;  %v64_v3 = vsel %vm62_vm1, %v1228_v2, 0  ;;  %v1229_v5 = vld [vmem:[#allocation5 + $0x18] sm:$0xff]   ;;  %v1231_v7 = vld [vmem:[#allocation5 + $0x28] sm:$0xff]   ;;  %v1232_v8 = vld [vmem:[#allocation5 + $0x30] sm:$0xff]   ;;  %v46_v10 = vshrl.u32 %v45_v9, 7  ;;  %vm152_vm4 = vcmask 523264  }
  0x29   :  { %1105 = vmatpush3.bf16.msra.mxu0 %v1227_v1  ;;  %1113 = vmatpush3.bf16.msra.mxu1 %v1229_v5  ;;  %v43_v11 = vld [vmem:[#allocation5 + $0x10] sm:$0x1]  ;;  %v1233_v27 = vld [vmem:[#allocation5 + $0x40] sm:$0xff]   ;;  %v1234_v28 = vld [vmem:[#allocation5 + $0x48] sm:$0xff]   ;;  %vm575_vm9 = vcmask 261120   ;;  %s1359_s1 = smov [#allocation7]  }
  0x2a   :  { %1106 = vmatprep.subr.bf16.mxu0 %v1357_v0  ;;  %1114 = vmatprep.subr.bf16.mxu1 %v1357_v0  ;;  %v44_v12 = vunpack.c.l.bf16 %v43_v11  ;;  %v1420_v13 = vsub.s32 0, %v46_v10  ;;  %v1235_v29 = vld [vmem:[#allocation5 + $0x50] sm:$0xff]   ;;  %v1236_v30 = vld [vmem:[#allocation5 + $0x58] sm:$0xff]   ;;  %v1237_v46 = vld [vmem:[#allocation5 + $0x68] sm:$0xff]   ;;  %s992_s6 = sshll.u32 %s1359_s1, 4  ;;  %vm984_vm15 = vcmask 130048   ;;  %s993_s6 = int_to_ptr.vmem [resolvable:$true] %s992_s6 }
  0x2b   :  { %v122_v31 = vld [vmem:[#allocation5 + $0x38] sm:$0x1]  ;;  %v1238_v47 = vld [vmem:[#allocation5 + $0x70] sm:$0xff]   ;;  %v1240_v49 = vld [vmem:[#allocation5 + $0x80] sm:$0xff]   ;;  %s1325_s7 = scalar_lea.vmem %s993_s6, 128  ;;  %p1330_p3 = scmp.lt.s32.totalorder %s993_s6, %s993_s6 }
  0x2c   :  { %v48_v14 = vrot.slane %v44_v12, %v1420_v13  ;;  %v123_v32 = vunpack.c.l.bf16 %v122_v31  ;;  %v1239_v48 = vld [vmem:[#allocation5 + $0x78] sm:$0xff]   ;;  %v212_v50 = vld [vmem:[#allocation5 + $0x60] sm:$0x1]  ;;  %v1241_v2 = vld [vmem:[#allocation5 + $0x90] sm:$0xff]   ;;  %p1326_p2 = scmp.ne.s32.totalorder %s993_s6, %s1325_s7  ;;  %p1331_p4 = scmp.lt.s32.totalorder %s1325_s7, %s1325_s7 }
  0x2d   :  { %1107 = vmatpush3.bf16.msra.mxu0 %v64_v3  ;;  %1115 = vmatpush3.bf16.msra.mxu1 %v1230_v6  ;;  %v213_v51 = vunpack.c.l.bf16 %v212_v50  ;;  %v1242_v3 = vld [vmem:[#allocation5 + $0x98] sm:$0xff]   ;;  %v1244_v5 = vld [vmem:[#allocation5 + $0xa8] sm:$0xff]  }
  0x2e   :  { %1124 = vmatprep.subr.bf16.mxu0 %v1357_v0  ;;  %1116 = vmatprep.subr.bf16.mxu1 %v1357_v0  ;;  %v127_v33 = vrot.slane %v123_v32, %v1420_v13  ;;  %v301_v6 = vld [vmem:[#allocation5 + $0x88] sm:$0x1]  ;;  %p1332_p5 = por %p1331_p4, %p1330_p3 }
  0x2f   :  { %v217_v52 = vrot.slane %v213_v51, %v1420_v13 }
  0x30   :  { %1109 = vmatmul.mubr.msk.bf16.vlgmr.msra.gmra.mrb[0].mxu0 %vm58_vm2, %v39_v4  ;;  %v1243_v4 = vld [vmem:[#allocation5 + $0xa0] sm:$0xff]   ;;  %p1333_p6 = pnand %p1332_p5, %p1326_p2 }
  0x31   :  { %1132 = vmatprep.mubr.msk.bf16.mxu0 %vm1358_vm0, %v1357_v0  ;;  %1117 = vmatpush3.bf16.msra.mxu1 %v1231_v7  ;;  %v302_v7 = vunpack.c.l.bf16 %v301_v6  ;;  %v1253_v6 = vld [vmem:[#allocation5 + $0x110] sm:$0xff]  }
  0x32   :  { %1118 = vmatprep.subr.bf16.mxu1 %v1357_v0  ;;  %1125 = vmatpush3.bf16.msra.mxu0 %v1233_v27  ;;  %v390_v27 = vld [vmem:[#allocation5 + $0xb0] sm:$0x1] }
  0x33   :  { %1126 = vmatprep.subr.bf16.mxu0 %v1357_v0 }
  0x35   :  { %1119 = vmatpush3.bf16.msra.mxu1 %v1232_v8  ;;  %v306_v8 = vrot.slane %v302_v7, %v1420_v13  ;;  %v1254_v7 = vld [vmem:[#allocation5 + $0x118] sm:$0xff]  }
  0x36   :  { %1136 = vmatprep.subr.bf16.mxu1 %v1357_v0  ;;  %1127 = vmatpush3.bf16.msra.mxu0 %v1234_v28  ;;  %v391_v28 = vunpack.c.l.bf16 %v390_v27 }
  0x37   :  { %1128 = vmatprep.subr.bf16.mxu0 %v1357_v0 }
  0x3a   :  { %1129 = vmatpush3.bf16.msra.mxu0 %v1235_v29  ;;  %v395_v29 = vrot.slane %v391_v28, %v1420_v13 }
  0x3b   :  { %1130 = vmatprep.subr.bf16.mxu0 %v1357_v0 }
  0x3e   :  { %1131 = vmatpush3.bf16.msra.mxu0 %v1236_v30 }
  0x3f   :  { %1148 = vmatprep.subr.bf16.mxu0 %v1357_v0 }
 0x103   :  { %v100_v15 = vpop.f32.mrb[0].mxu0 }
 0x104   :  { %v101_v16 = vadd.f32 %v100_v15, %v48_v14  ;;  %v1110_v17 = vpop.f32.mrb[1].mxu0 }
 0x105   :  { %v103_v18 = vpop.f32.mrb[2].mxu0 }
 0x106   :  { %v107_v19 = vmul.f32 1.442695, %v101_v16  ;;  %v1111_v20 = vpop.f32.mrb[3].mxu0  ;;  %vm106_vm3 = vcmp.gt.f32.partialorder %v101_v16, 0.0 }
 0x108   :  { %1261 = vpow2.f32 %v107_v19 }
 0x112   :  { %v1262_v21 = vpop.eup %1261 }
 0x113   :  { %v1005_v22 = vadd.f32 -1.0, %v1262_v21 }
 0x115   :  { %v110_v23 = vmul.f32 1.6732632, %v1005_v22  ;;  %v1245_v22 = vld [vmem:[#allocation5 + $0xb8] sm:$0xff]  }
 0x117   :  { %v111_v24 = vsel %vm106_vm3, %v101_v16, %v110_v23  ;;  %v1246_v23 = vld [vmem:[#allocation5 + $0xc0] sm:$0xff]  }
 0x118   :  { %v112_v25 = vmul.f32 1.050701, %v111_v24  ;;  %v1247_v24 = vld [vmem:[#allocation5 + $0xc8] sm:$0xff]  }
 0x11a   :  { %v113_v26 = vpack.c.bf16 %v112_v25, %v112_v25  ;;  %v1248_v25 = vld [vmem:[#allocation5 + $0xd0] sm:$0xff]  }
 0x11c   :  { %1121 = vmatmul.mubr.msk.bf16.vlgmr.msra.gmra.mrb[0].mxu1 %vm152_vm4, %v113_v26  ;;  %v1249_v26 = vld [vmem:[#allocation5 + $0xe0] sm:$0xff]  }
 0x11d   :  { %1144 = vmatprep.mubr.msk.bf16.mxu1 %vm1358_vm0, %v1357_v0  ;;  %1137 = vmatpush3.bf16.msra.mxu1 %v1237_v46 }
 0x11e   :  { %1138 = vmatprep.subr.bf16.mxu1 %v1357_v0 }
 0x121   :  { %1139 = vmatpush3.bf16.msra.mxu1 %v1238_v47 }
 0x122   :  { %1140 = vmatprep.subr.bf16.mxu1 %v1357_v0 }
 0x125   :  { %1141 = vmatpush3.bf16.msra.mxu1 %v1239_v48 }
 0x126   :  { %1142 = vmatprep.subr.bf16.mxu1 %v1357_v0 }
 0x129   :  { %1143 = vmatpush3.bf16.msra.mxu1 %v1240_v49 }
 0x12a   :  { %1160 = vmatprep.subr.bf16.mxu1 %v1357_v0 }
 0x1ef   :  { %v190_v34 = vpop.f32.mrb[0].mxu1 }
 0x1f0   :  { %v191_v35 = vadd.f32 %v190_v34, %v127_v33  ;;  %v1122_v36 = vpop.f32.mrb[1].mxu1 }
 0x1f1   :  { %v193_v37 = vpop.f32.mrb[2].mxu1 }
 0x1f2   :  { %v197_v38 = vmul.f32 1.442695, %v191_v35  ;;  %v1123_v39 = vpop.f32.mrb[3].mxu1  ;;  %vm196_vm5 = vcmp.gt.f32.partialorder %v191_v35, 0.0 }
 0x1f4   :  { %1263 = vpow2.f32 %v197_v38 }
 0x1fe   :  { %v1264_v40 = vpop.eup %1263 }
 0x1ff   :  { %v1011_v41 = vadd.f32 -1.0, %v1264_v40 }
 0x201   :  { %v200_v42 = vmul.f32 1.6732632, %v1011_v41 }
 0x203   :  { %v201_v43 = vsel %vm196_vm5, %v191_v35, %v200_v42  ;;  %v1250_v42 = vld [vmem:[#allocation5 + $0xe8] sm:$0xff]  }
 0x204   :  { %v202_v44 = vmul.f32 1.050701, %v201_v43  ;;  %v479_v43 = vld [vmem:[#allocation5 + $0xd8] sm:$0x1] }
 0x206   :  { %v203_v45 = vpack.c.bf16 %v202_v44, %v202_v44  ;;  %v480_v44 = vunpack.c.l.bf16 %v479_v43  ;;  %v777_v43 = vld [vmem:[#allocation5 + $0x138] sm:$0x1] }
 0x208   :  { %1133 = vmatmul.mubr.msk.bf16.vlgmr.msra.gmra.mrb[4].mxu0 %vm152_vm4, %v203_v45  ;;  %v484_v45 = vrot.slane %v480_v44, %v1420_v13  ;;  %v778_v44 = vunpack.c.l.bf16 %v777_v43 }
 0x209   :  { %1156 = vmatprep.mubr.msk.bf16.mxu0 %vm1358_vm0, %v1357_v0  ;;  %1149 = vmatpush3.bf16.msra.mxu0 %v1241_v2 }
 0x20a   :  { %1150 = vmatprep.subr.bf16.mxu0 %v1357_v0 }
 0x20d   :  { %1151 = vmatpush3.bf16.msra.mxu0 %v1242_v3 }
 0x20e   :  { %1152 = vmatprep.subr.bf16.mxu0 %v1357_v0 }
 0x211   :  { %1153 = vmatpush3.bf16.msra.mxu0 %v1243_v4 }
 0x212   :  { %1154 = vmatprep.subr.bf16.mxu0 %v1357_v0 }
 0x215   :  { %1155 = vmatpush3.bf16.msra.mxu0 %v1244_v5 }
 0x216   :  { %1172 = vmatprep.subr.bf16.mxu0 %v1357_v0 }
 0x2db   :  { %v279_v53 = vpop.f32.mrb[4].mxu0 }
 0x2dc   :  { %v280_v54 = vadd.f32 %v279_v53, %v217_v52  ;;  %v1134_v55 = vpop.f32.mrb[5].mxu0  ;;  %v1251_v52 = vld [vmem:[#allocation5 + $0xf8] sm:$0xff]   ;;  %v1252_v53 = vld [vmem:[#allocation5 + $0x100] sm:$0xff]  }
 0x2dd   :  { %v282_v56 = vpop.f32.mrb[6].mxu0 }
 0x2de   :  { %v286_v57 = vmul.f32 1.442695, %v280_v54  ;;  %v1135_v58 = vpop.f32.mrb[7].mxu0  ;;  %vm285_vm6 = vcmp.gt.f32.partialorder %v280_v54, 0.0 }
 0x2e0   :  { %1265 = vpow2.f32 %v286_v57 }
 0x2ea   :  { %v1266_v59 = vpop.eup %1265 }
 0x2eb   :  { %v1017_v60 = vadd.f32 -1.0, %v1266_v59 }
 0x2ed   :  { %v289_v61 = vmul.f32 1.6732632, %v1017_v60 }
 0x2ef   :  { %v290_v62 = vsel %vm285_vm6, %v280_v54, %v289_v61  ;;  %v557_v54 = vld [vmem:[#allocation5 + $0xf0] sm:$0x1] }
 0x2f0   :  { %v291_v63 = vmul.f32 1.050701, %v290_v62  ;;  %v558_v55 = vunpack.c.l.bf16 %v557_v54 }
 0x2f2   :  { %v292_v1 = vpack.c.bf16 %v291_v63, %v291_v63  ;;  %v562_v56 = vrot.slane %v558_v55, %v1420_v13 }
 0x2f4   :  { %1145 = vmatmul.mubr.msk.bf16.vlgmr.msra.gmra.mrb[4].mxu1 %vm152_vm4, %v292_v1 }
 0x2f5   :  { %1168 = vmatprep.mubr.msk.bf16.mxu1 %vm1358_vm0, %v1357_v0  ;;  %1161 = vmatpush3.bf16.msra.mxu1 %v1245_v22 }
 0x2f6   :  { %1162 = vmatprep.subr.bf16.mxu1 %v1357_v0 }
 0x2f9   :  { %1163 = vmatpush3.bf16.msra.mxu1 %v1246_v23 }
 0x2fa   :  { %1164 = vmatprep.subr.bf16.mxu1 %v1357_v0 }
 0x2fd   :  { %1165 = vmatpush3.bf16.msra.mxu1 %v1247_v24  ;;  %v1255_v24 = vld [vmem:[#allocation5 + $0x128] sm:$0xff]  }
 0x2fe   :  { %1166 = vmatprep.subr.bf16.mxu1 %v1357_v0 }
 0x301   :  { %1167 = vmatpush3.bf16.msra.mxu1 %v1248_v25  ;;  %v1256_v25 = vld [vmem:[#allocation5 + $0x130] sm:$0xff]  }
 0x302   :  { %1188 = vmatprep.subr.bf16.mxu1 %v1357_v0 }
 0x3c7   :  { %v368_v9 = vpop.f32.mrb[4].mxu1 }
 0x3c8   :  { %v369_v10 = vadd.f32 %v368_v9, %v306_v8  ;;  %v1146_v11 = vpop.f32.mrb[5].mxu1  ;;  %v631_v8 = vld [vmem:[#allocation5 + $0x108] sm:$0x1] }
 0x3c9   :  { %v371_v12 = vpop.f32.mrb[6].mxu1  ;;  %v632_v9 = vunpack.c.l.bf16 %v631_v8 }
 0x3ca   :  { %v375_v14 = vmul.f32 1.442695, %v369_v10  ;;  %v1147_v15 = vpop.f32.mrb[7].mxu1  ;;  %vm374_vm7 = vcmp.gt.f32.partialorder %v369_v10, 0.0 }
 0x3cc   :  { %1267 = vpow2.f32 %v375_v14 }
 0x3d6   :  { %v1268_v16 = vpop.eup %1267 }
 0x3d7   :  { %v1023_v17 = vadd.f32 -1.0, %v1268_v16 }
 0x3d9   :  { %v378_v18 = vmul.f32 1.6732632, %v1023_v17 }
 0x3db   :  { %v379_v19 = vsel %vm374_vm7, %v369_v10, %v378_v18  ;;  %v636_v10 = vrot.slane %v632_v9, %v1420_v13 }
 0x3dc   :  { %v380_v20 = vmul.f32 1.050701, %v379_v19 }
 0x3de   :  { %v381_v21 = vpack.c.bf16 %v380_v20, %v380_v20 }
 0x3e0   :  { %1157 = vmatmul.mubr.msk.bf16.vlgmr.msra.gmra.mrb[8].mxu0 %vm152_vm4, %v381_v21 }
 0x3e1   :  { %1176 = vmatprep.mubr.msk.bf16.mxu0 %vm1358_vm0, %v1357_v0  ;;  %1173 = vmatpush3.bf16.msra.mxu0 %v1249_v26  ;;  %v704_v26 = vld [vmem:[#allocation5 + $0x120] sm:$0x1] }
 0x3e2   :  { %1174 = vmatprep.subr.bf16.mxu0 %v1357_v0  ;;  %v705_v27 = vunpack.c.l.bf16 %v704_v26 }
 0x3e4   :  { %v709_v28 = vrot.slane %v705_v27, %v1420_v13 }
 0x3e5   :  { %1175 = vmatpush3.bf16.msra.mxu0 %v1250_v42  ;;  %v1258_v42 = vld [vmem:[#allocation5 + $0x148] sm:$0xff]  }
 0x3e6   :  { %1180 = vmatprep.subr.bf16.mxu0 %v1357_v0 }
 0x4b3   :  { %v457_v30 = vpop.f32.mrb[8].mxu0 }
 0x4b4   :  { %v458_v31 = vadd.f32 %v457_v30, %v395_v29  ;;  %v1158_v32 = vpop.f32.mrb[9].mxu0 }
 0x4b5   :  { %v460_v33 = vpop.f32.mrb[10].mxu0 }
 0x4b6   :  { %v464_v34 = vmul.f32 1.442695, %v458_v31  ;;  %v1159_v35 = vpop.f32.mrb[11].mxu0  ;;  %vm463_vm8 = vcmp.gt.f32.partialorder %v458_v31, 0.0 }
 0x4b8   :  { %1269 = vpow2.f32 %v464_v34 }
 0x4c2   :  { %v1270_v36 = vpop.eup %1269 }
 0x4c3   :  { %v1029_v37 = vadd.f32 -1.0, %v1270_v36 }
 0x4c5   :  { %v467_v38 = vmul.f32 1.6732632, %v1029_v37 }
 0x4c7   :  { %v468_v39 = vsel %vm463_vm8, %v458_v31, %v467_v38 }
 0x4c8   :  { %v469_v40 = vmul.f32 1.050701, %v468_v39 }
 0x4ca   :  { %v470_v41 = vpack.c.bf16 %v469_v40, %v469_v40 }
 0x4cc   :  { %1169 = vmatmul.mubr.msk.bf16.vlgmr.msra.gmra.mrb[8].mxu1 %vm152_vm4, %v470_v41  ;;  %v1257_v41 = vld [vmem:[#allocation5 + $0x140] sm:$0xff]  }
 0x4cd   :  { %1192 = vmatprep.mubr.msk.bf16.mxu1 %vm1358_vm0, %v1357_v0  ;;  %1189 = vmatpush3.bf16.msra.mxu1 %v1253_v6 }
 0x4ce   :  { %1190 = vmatprep.subr.bf16.mxu1 %v1357_v0 }
 0x4d1   :  { %1191 = vmatpush3.bf16.msra.mxu1 %v1254_v7 }
 0x4d2   :  { %1204 = vmatprep.subr.bf16.mxu1 %v1357_v0 }
 0x59f   :  { %v546_v46 = vpop.f32.mrb[8].mxu1 }
 0x5a0   :  { %v547_v47 = vadd.f32 %v546_v46, %v484_v45  ;;  %v1170_v48 = vpop.f32.mrb[9].mxu1  ;;  %v782_v45 = vrot.slane %v778_v44, %v1420_v13 }
 0x5a1   :  { %v549_v49 = vpop.f32.mrb[10].mxu1 }
 0x5a2   :  { %v552_v50 = vpack.c.bf16 %v547_v47, %v547_v47  ;;  %v1171_v51 = vpop.f32.mrb[11].mxu1 }
 0x5a4   :  { %1177 = vmatmul.mubr.msk.bf16.vlgmr.msra.gmra.mrb[12].mxu0 %vm575_vm9, %v552_v50 }
 0x5a5   :  { %1184 = vmatprep.mubr.msk.bf16.mxu0 %vm1358_vm0, %v1357_v0  ;;  %1181 = vmatpush3.bf16.msra.mxu0 %v1251_v52 }
 0x5a6   :  { %1182 = vmatprep.subr.bf16.mxu0 %v1357_v0 }
 0x5a9   :  { %1183 = vmatpush3.bf16.msra.mxu0 %v1252_v53 }
 0x5aa   :  { %1196 = vmatprep.subr.bf16.mxu0 %v1357_v0 }
 0x677   :  { %v613_v57 = vpop.f32.mrb[12].mxu0 }
 0x678   :  { %v614_v58 = vadd.f32 %v613_v57, %v562_v56  ;;  %v1178_v59 = vpop.f32.mrb[13].mxu0 }
 0x679   :  { %v616_v60 = vpop.f32.mrb[14].mxu0  ;;  %v1260_v59 = vld [vmem:[#allocation5 + $0x160] sm:$0xff]  }
 0x67a   :  { %v620_v61 = vmul.f32 1.442695, %v614_v58  ;;  %v1179_v62 = vpop.f32.mrb[15].mxu0  ;;  %vm619_vm10 = vcmp.gt.f32.partialorder %v614_v58, 0.0  ;;  %v850_v60 = vld [vmem:[#allocation5 + $0x150] sm:$0x1] }
 0x67c   :  { %1271 = vpow2.f32 %v620_v61  ;;  %v851_v61 = vunpack.c.l.bf16 %v850_v60 }
 0x67e   :  { %v855_v62 = vrot.slane %v851_v61, %v1420_v13 }
 0x686   :  { %v1272_v63 = vpop.eup %1271 }
 0x687   :  { %v1038_v1 = vadd.f32 -1.0, %v1272_v63 }
 0x689   :  { %v623_v2 = vmul.f32 1.6732632, %v1038_v1 }
 0x68b   :  { %v624_v3 = vsel %vm619_vm10, %v614_v58, %v623_v2  ;;  %v1259_v58 = vld [vmem:[#allocation5 + $0x158] sm:$0xff]  }
 0x68c   :  { %v625_v4 = vmul.f32 1.050701, %v624_v3 }
 0x68e   :  { %v626_v5 = vpack.c.bf16 %v625_v4, %v625_v4 }
 0x690   :  { %1185 = vmatmul.mubr.msk.bf16.vlgmr.msra.gmra.mrb[16].mxu0 %vm575_vm9, %v626_v5 }
 0x691   :  { %1200 = vmatprep.mubr.msk.bf16.mxu0 %vm1358_vm0, %v1357_v0  ;;  %1197 = vmatpush3.bf16.msra.mxu0 %v1255_v24 }
 0x692   :  { %1198 = vmatprep.subr.bf16.mxu0 %v1357_v0 }
 0x695   :  { %1199 = vmatpush3.bf16.msra.mxu0 %v1256_v25 }
 0x696   :  { %1212 = vmatprep.subr.bf16.mxu0 %v1357_v0 }
 0x763   :  { %v686_v11 = vpop.f32.mrb[16].mxu0 }
 0x764   :  { %v687_v12 = vadd.f32 %v686_v11, %v636_v10  ;;  %v1186_v14 = vpop.f32.mrb[17].mxu0  ;;  %v923_v11 = vld [vmem:[#allocation5 + $0x168] sm:$0x1] }
 0x765   :  { %v689_v15 = vpop.f32.mrb[18].mxu0 }
 0x766   :  { %v693_v16 = vmul.f32 1.442695, %v687_v12  ;;  %v1187_v17 = vpop.f32.mrb[19].mxu0  ;;  %vm692_vm11 = vcmp.gt.f32.partialorder %v687_v12, 0.0 }
 0x768   :  { %1273 = vpow2.f32 %v693_v16 }
 0x772   :  { %v1274_v18 = vpop.eup %1273 }
 0x773   :  { %v1042_v19 = vadd.f32 -1.0, %v1274_v18 }
 0x775   :  { %v696_v20 = vmul.f32 1.6732632, %v1042_v19 }
 0x777   :  { %v697_v21 = vsel %vm692_vm11, %v687_v12, %v696_v20  ;;  %v924_v12 = vunpack.c.l.bf16 %v923_v11 }
 0x778   :  { %v698_v22 = vmul.f32 1.050701, %v697_v21 }
 0x779   :  { %v928_v14 = vrot.slane %v924_v12, %v1420_v13 }
 0x77a   :  { %v699_v23 = vpack.c.bf16 %v698_v22, %v698_v22 }
 0x77c   :  { %1193 = vmatmul.mubr.msk.bf16.vlgmr.msra.gmra.mrb[12].mxu1 %vm575_vm9, %v699_v23 }
 0x77d   :  { %1208 = vmatprep.mubr.msk.bf16.mxu1 %vm1358_vm0, %v1357_v0  ;;  %1205 = vmatpush3.bf16.msra.mxu1 %v1257_v41 }
 0x77e   :  { %1206 = vmatprep.subr.bf16.mxu1 %v1357_v0 }
 0x781   :  { %1207 = vmatpush3.bf16.msra.mxu1 %v1258_v42 }
 0x84f   :  { %v759_v29 = vpop.f32.mrb[12].mxu1 }
 0x850   :  { %v760_v30 = vadd.f32 %v759_v29, %v709_v28  ;;  %v1194_v31 = vpop.f32.mrb[13].mxu1 }
 0x851   :  { %v762_v32 = vpop.f32.mrb[14].mxu1 }
 0x852   :  { %v766_v33 = vmul.f32 1.442695, %v760_v30  ;;  %v1195_v34 = vpop.f32.mrb[15].mxu1  ;;  %vm765_vm12 = vcmp.gt.f32.partialorder %v760_v30, 0.0 }
 0x854   :  { %1275 = vpow2.f32 %v766_v33 }
 0x85e   :  { %v1276_v35 = vpop.eup %1275 }
 0x85f   :  { %v1046_v36 = vadd.f32 -1.0, %v1276_v35 }
 0x861   :  { %v769_v37 = vmul.f32 1.6732632, %v1046_v36 }
 0x863   :  { %v770_v38 = vsel %vm765_vm12, %v760_v30, %v769_v37 }
 0x864   :  { %v771_v39 = vmul.f32 1.050701, %v770_v38 }
 0x866   :  { %v772_v40 = vpack.c.bf16 %v771_v39, %v771_v39 }
 0x868   :  { %1201 = vmatmul.mubr.msk.bf16.vlgmr.msra.gmra.mrb[20].mxu0 %vm575_vm9, %v772_v40 }
 0x869   :  { %1216 = vmatprep.mubr.msk.bf16.mxu0 %vm1358_vm0, %v1357_v0  ;;  %1213 = vmatpush3.bf16.msra.mxu0 %v1259_v58 }
 0x86a   :  { %1214 = vmatprep.subr.bf16.mxu0 %v1357_v0 }
 0x86d   :  { %1215 = vmatpush3.bf16.msra.mxu0 %v1260_v59 }
 0x93b   :  { %v832_v46 = vpop.f32.mrb[20].mxu0 }
 0x93c   :  { %v833_v47 = vadd.f32 %v832_v46, %v782_v45  ;;  %v1202_v48 = vpop.f32.mrb[21].mxu0 }
 0x93d   :  { %v835_v49 = vpop.f32.mrb[22].mxu0 }
 0x93e   :  { %v839_v50 = vmul.f32 1.442695, %v833_v47  ;;  %v1203_v51 = vpop.f32.mrb[23].mxu0  ;;  %vm838_vm13 = vcmp.gt.f32.partialorder %v833_v47, 0.0 }
 0x940   :  { %1277 = vpow2.f32 %v839_v50 }
 0x94a   :  { %v1278_v52 = vpop.eup %1277 }
 0x94b   :  { %v1050_v53 = vadd.f32 -1.0, %v1278_v52 }
 0x94d   :  { %v842_v54 = vmul.f32 1.6732632, %v1050_v53 }
 0x94f   :  { %v843_v55 = vsel %vm838_vm13, %v833_v47, %v842_v54 }
 0x950   :  { %v844_v56 = vmul.f32 1.050701, %v843_v55 }
 0x952   :  { %v845_v57 = vpack.c.bf16 %v844_v56, %v844_v56 }
 0x954   :  { %1209 = vmatmul.mubr.msk.bf16.vlgmr.msra.gmra.mrb[16].mxu1 %vm575_vm9, %v845_v57 }
 0xa27   :  { %v905_v63 = vpop.f32.mrb[16].mxu1 }
 0xa28   :  { %v906_v1 = vadd.f32 %v905_v63, %v855_v62  ;;  %v1210_v2 = vpop.f32.mrb[17].mxu1 }
 0xa29   :  { %v908_v3 = vpop.f32.mrb[18].mxu1 }
 0xa2a   :  { %v912_v4 = vmul.f32 1.442695, %v906_v1  ;;  %v1211_v5 = vpop.f32.mrb[19].mxu1  ;;  %vm911_vm14 = vcmp.gt.f32.partialorder %v906_v1, 0.0 }
 0xa2c   :  { %1279 = vpow2.f32 %v912_v4 }
 0xa36   :  { %v1280_v6 = vpop.eup %1279 }
 0xa37   :  { %v1054_v7 = vadd.f32 -1.0, %v1280_v6 }
 0xa39   :  { %v915_v8 = vmul.f32 1.6732632, %v1054_v7 }
 0xa3b   :  { %v916_v9 = vsel %vm911_vm14, %v906_v1, %v915_v8 }
 0xa3c   :  { %v917_v10 = vmul.f32 1.050701, %v916_v9 }
 0xa3e   :  { %v918_v0 = vpack.c.bf16 %v917_v10, %v917_v10 }
 0xa40   :  { %1217 = vmatmul.mubr.msk.bf16.vlgmr.msra.gmra.mrb[24].mxu0 %vm575_vm9, %v918_v0 }
 0xb13   :  { %v978_v15 = vpop.f32.mrb[24].mxu0 }
 0xb14   :  { %v979_v16 = vadd.f32 %v978_v15, %v928_v14  ;;  %v1218_v17 = vpop.f32.mrb[25].mxu0 }
 0xb15   :  { %v981_v18 = vpop.f32.mrb[26].mxu0 }
 0xb16   :  { %v1219_v19 = vpop.f32.mrb[27].mxu0  ;;  %985 = vst.msk [vmem:[#allocation7] sm:$0xff] %vm984_vm15, %v979_v16 }
 0xb17   :  { %1336 = shalt.err (!%p1333_p6)
}
 0xb18   :  { %s1337_s10 = scalar_lea.hbm %s1503_s2, 128 }
 0xb19   :  { %p1338_p7 = scmp.ne.s32.totalorder %s1503_s2, %s1337_s10  ;;  %p1341_p8 = scmp.lt.u32.totalorder %s1337_s10, %s1503_s2 }
 0xb1b   :  { %p1343_p9 = pnand %p1341_p8, %p1338_p7 }
 0xb1d   :  { %1346 = shalt.err (!%p1343_p9)
}
 0xb1e   :  { %995 = dma.vmem_to_hbm [thread:$0]  %s993_s6, 128, %s1503_s2, [#allocation4]  }
 0xb1f   :  { %1351 = dma.done.wait [#allocation4], 128  }
 0xb20   :  { %1352 = vsyncadd [#allocation4], 4294967168 }
 0xb21   :  { %999 = vsyncpa [#allocation3], 1 }
 0xb22   :  { %1000 = vsyncpa [#allocation6], 1 }
 0xb23   :  { %1001 = vsyncpa [#allocation4], 1 }

</bundles_post_ra>
